<compile_context>
chip_gen: v7x
topology: tpu7x:2x2x1
jax: 0.10.0
libtpu: 0.0.40
codegen_flags: <defaults>
</compile_context>

<pallas_src>
import jax
import jax.numpy as jnp
from jax.experimental import pallas as pl
from jax.experimental.pallas import tpu as pltpu


# ---------------------------------------------------------------------------
# Kernels
# ---------------------------------------------------------------------------
def _mlp_kernel_resident(x_ref, w1_ref, b1_ref, w2_ref, b2_ref, o_ref):
    """Both (pre-transposed) weight matrices fully resident in VMEM."""
    # h = x @ W1t + b1   (bf16 operands, f32 MXU accumulation, f32 bias add)
    h = jnp.dot(x_ref[...], w1_ref[...], preferred_element_type=jnp.float32)
    h = h + b1_ref[...]
    # y = h @ W2t + b2   (h recast to compute dtype; no VMEM scratch round trip)
    o = jnp.dot(h.astype(w2_ref.dtype), w2_ref[...],
                preferred_element_type=jnp.float32)
    o_ref[...] = (o + b2_ref[...]).astype(o_ref.dtype)


def _mlp_kernel_hidden_tiled(x_ref, w1_ref, b1_ref, w2_ref, b2_ref, o_ref,
                             acc_ref):
    """Hidden dim tiled (reduction grid axis, last); f32 accumulator scratch."""
    k = pl.program_id(1)

    @pl.when(k == 0)
    def _init():
        acc_ref[...] = jnp.zeros_like(acc_ref)

    h = jnp.dot(x_ref[...], w1_ref[...], preferred_element_type=jnp.float32)
    h = h + b1_ref[...]
    acc_ref[...] += jnp.dot(h.astype(w2_ref.dtype), w2_ref[...],
                            preferred_element_type=jnp.float32)

    @pl.when(k == pl.num_programs(1) - 1)
    def _finalize():
        o_ref[...] = (acc_ref[...] + b2_ref[...]).astype(o_ref.dtype)


# ---------------------------------------------------------------------------
# Tiling / VMEM budgeting helpers
# ---------------------------------------------------------------------------
def _round_up(x, m):
    return (x + m - 1) // m * m


def _vmem_budget_bytes(max_vmem_bytes=None):
    """Per-core VMEM budget used for tile selection (soft budget)."""
    if max_vmem_bytes is not None:
        return int(max_vmem_bytes)
    try:
        cap = int(pltpu.get_tpu_info().vmem_capacity_bytes)
    except Exception:  # pragma: no cover — conservative default (v7x per-TC)
        cap = 64 * 1024 * 1024
    # Leave ~25% headroom for Mosaic-internal scratch / misc buffers:
    # v7x 64 MiB -> 48 MiB budget, v5e/v6e 128 MiB -> 96 MiB budget.
    return (cap // 4) * 3


def _footprint_bytes(tm, th, nk, d_in, d_out_pad, cb, out_itemsize):
    """Approximate VMEM footprint for a (tm, th) tiling choice."""
    nbuf_w = 1 if nk == 1 else 2   # constant-index weights -> single buffer
    weights = nbuf_w * (d_in * th * cb + th * d_out_pad * cb + th * 4) + d_out_pad * 4
    io = 2 * tm * d_in * cb + 2 * tm * d_out_pad * out_itemsize  # x/out double-buffered
    acc = 0 if nk == 1 else tm * d_out_pad * 4                   # f32 accumulator
    return weights + io + acc


def _choose_tiles(B, d_in, d_hidden, d_out_pad, cb, out_itemsize, budget):
    if B <= 8:
        tm_cands = [max(B, 1)]
    else:
        tm_cands = [t for t in (2048, 1024, 512, 256, 128, 64, 32, 16, 8)
                    if t <= B] or [8]

    # Plan A: both weight matrices fully resident (single batch grid axis).
    for tm in tm_cands:
        if _footprint_bytes(tm, d_hidden, 1, d_in, d_out_pad, cb, out_itemsize) <= budget:
            return tm, d_hidden

    # Plan B: tile the hidden dim (reduction axis, placed last in the grid).
    th_cands = [t for t in (2048, 1024, 512, 256, 128)
                if t < _round_up(d_hidden, 128)]
    for tm in tm_cands:
        for th in th_cands:
            nk = _round_up(d_hidden, th) // th
            if _footprint_bytes(tm, th, nk, d_in, d_out_pad, cb, out_itemsize) <= budget:
                return tm, th

    # Fallback: smallest tiles; may exceed the budget for extreme configs.
    return tm_cands[-1], (th_cands[-1] if th_cands else d_hidden)


# ---------------------------------------------------------------------------
# Public wrapper
# ---------------------------------------------------------------------------
def mlp_forward(x, w1, b1, w2, b2, *, compute_dtype=jnp.bfloat16,
                max_vmem_bytes=None):
    """Pallas MLP forward: (x @ w1.T + b1) @ w2.T + b2.

    x  : (..., input_size)
    w1 : (hidden_size, input_size)   -- PyTorch nn.Linear layout
    b1 : (hidden_size,)
    w2 : (output_size, hidden_size)  -- PyTorch nn.Linear layout
    b2 : (output_size,)
    """
    orig_leading = x.shape[:-1]
    d_in = x.shape[-1]
    d_hidden, d_in_w = w1.shape
    d_out, d_hidden_w = w2.shape
    assert d_in_w == d_in and d_hidden_w == d_hidden

    x2 = x.reshape(-1, d_in)
    B = x2.shape[0]
    out_dtype = x.dtype
    out_itemsize = jnp.dtype(out_dtype).itemsize
    cb = jnp.dtype(compute_dtype).itemsize

    # Lane-dense output writeback: pad the output feature dim to a multiple of 128.
    d_out_pad = _round_up(d_out, 128)

    budget = _vmem_budget_bytes(max_vmem_bytes)
    tm, th = _choose_tiles(B, d_in, d_hidden, d_out_pad, cb, out_itemsize, budget)
    if th >= d_hidden:
        th = d_hidden
        d_hidden_pad = d_hidden
        nk = 1
    else:
        d_hidden_pad = _round_up(d_hidden, th)
        nk = d_hidden_pad // th

    # One-time wrapper-side layout & dtype prep (amortized over the whole grid):
    #  * pre-transpose to (in, hidden) / (hidden, out) -> plain K-major dots,
    #  * cast matmul operands to bf16 (MXU-native), biases stay f32,
    #  * zero-pad hidden/output dims (exact: padded rows/cols contribute 0).
    xc = x2.astype(compute_dtype)
    w1t = jnp.transpose(w1).astype(compute_dtype)          # (d_in, d_hidden)
    w2t = jnp.transpose(w2).astype(compute_dtype)          # (d_hidden, d_out)
    b1r = b1.astype(jnp.float32).reshape(1, d_hidden)
    b2r = b2.astype(jnp.float32).reshape(1, d_out)
    if d_hidden_pad != d_hidden:
        ph = d_hidden_pad - d_hidden
        w1t = jnp.pad(w1t, ((0, 0), (0, ph)))
        w2t = jnp.pad(w2t, ((0, ph), (0, 0)))
        b1r = jnp.pad(b1r, ((0, 0), (0, ph)))
    if d_out_pad != d_out:
        po = d_out_pad - d_out
        w2t = jnp.pad(w2t, ((0, 0), (0, po)))
        b2r = jnp.pad(b2r, ((0, 0), (0, po)))

    flops = 2 * B * (d_in * d_hidden + d_hidden * d_out)
    bytes_accessed = (xc.size * cb + w1t.size * cb + w2t.size * cb
                      + b1r.size * 4 + b2r.size * 4 + B * d_out_pad * out_itemsize)
    cost = pl.CostEstimate(flops=flops, transcendentals=0,
                           bytes_accessed=bytes_accessed)

    footprint = _footprint_bytes(tm, th, nk, d_in, d_out_pad, cb, out_itemsize)
    vmem_limit = int(min(max(2 * footprint, 32 * 1024 * 1024), budget))
    vmem_limit = int(max(vmem_limit, footprint + 2 * 1024 * 1024))

    def run(use_buffered):
        def spec(shape, index_map, resident=False):
            if resident and use_buffered:
                # Constant-index operand: single pipeline buffer (saves VMEM).
                return pl.BlockSpec(shape, index_map, pipeline_mode=pl.Buffered(1))
            return pl.BlockSpec(shape, index_map)

        if nk == 1:
            grid = (pl.cdiv(B, tm),)
            in_specs = [
                spec((tm, d_in), lambda i: (i, 0)),                              # x tile
                spec((d_in, d_hidden_pad), lambda i: (0, 0), resident=True),     # W1t
                spec((1, d_hidden_pad), lambda i: (0, 0), resident=True),        # b1
                spec((d_hidden_pad, d_out_pad), lambda i: (0, 0), resident=True),# W2t
                spec((1, d_out_pad), lambda i: (0, 0), resident=True),           # b2
            ]
            out_specs = spec((tm, d_out_pad), lambda i: (i, 0))
            kernel = _mlp_kernel_resident
            scratch_shapes = []
            dims = ("parallel",)
        else:
            grid = (pl.cdiv(B, tm), nk)   # batch parallel, hidden reduction last
            in_specs = [
                spec((tm, d_in), lambda i, k: (i, 0)),                  # x tile (resident over k)
                spec((d_in, th), lambda i, k: (0, k)),                  # W1t hidden slice
                spec((1, th), lambda i, k: (0, k)),                     # b1 hidden slice
                spec((th, d_out_pad), lambda i, k: (k, 0)),             # W2t hidden slice
                spec((1, d_out_pad), lambda i, k: (0, 0), resident=True),  # b2
            ]
            out_specs = spec((tm, d_out_pad), lambda i, k: (i, 0))
            kernel = _mlp_kernel_hidden_tiled
            scratch_shapes = [pltpu.VMEM((tm, d_out_pad), jnp.float32)]
            dims = ("parallel", "arbitrary")

        return pl.pallas_call(
            kernel,
            out_shape=jax.ShapeDtypeStruct((B, d_out_pad), out_dtype),
            grid=grid,
            in_specs=in_specs,
            out_specs=out_specs,
            scratch_shapes=scratch_shapes,
            compiler_params=pltpu.CompilerParams(
                dimension_semantics=dims,
                vmem_limit_bytes=vmem_limit,
            ),
            cost_estimate=cost,
        )(xc, w1t, b1r, w2t, b2r)

    try:
        out = run(use_buffered=True)
    except Exception:
        # Fallback for environments where BlockSpec(pipeline_mode=...) is not
        # supported; identical semantics, just default double-buffering.
        out = run(use_buffered=False)

    if d_out_pad != d_out:
        out = out[:, :d_out]
    return out.reshape(orig_leading + (d_out,))


def mlp_reference(x, w1, b1, w2, b2, compute_dtype=jnp.bfloat16):
    """Reference matching the kernel's numerics (bf16 matmuls, f32 accumulate)."""
    xc = x.astype(compute_dtype)
    h = jnp.dot(xc, w1.T.astype(compute_dtype),
                preferred_element_type=jnp.float32) + b1.astype(jnp.float32)
    o = jnp.dot(h.astype(compute_dtype), w2.T.astype(compute_dtype),
                preferred_element_type=jnp.float32) + b2.astype(jnp.float32)
    return o.astype(x.dtype)


# ---------------------------------------------------------------------------
# Demo / self-test
# ---------------------------------------------------------------------------
if __name__ == "__main__":
    key = jax.random.PRNGKey(0)

    # --- Small shapes consistent with the module (resident-weights path;
    #     output padded 16 -> 128 for a lane-dense writeback). ---
    batch, input_size, hidden_size, output_size = 8, 32, 64, 16
    kx, kw1, kb1, kw2, kb2, krest = jax.random.split(key, 6)

    x = jax.random.normal(kx, (batch, input_size), dtype=jnp.float32)
    w1 = jax.random.normal(kw1, (hidden_size, input_size), dtype=jnp.float32) * 0.1
    b1 = jax.random.normal(kb1, (hidden_size,), dtype=jnp.float32) * 0.1
    w2 = jax.random.normal(kw2, (output_size, hidden_size), dtype=jnp.float32) * 0.1
    b2 = jax.random.normal(kb2, (output_size,), dtype=jnp.float32) * 0.1

    out = jax.block_until_ready(mlp_forward(x, w1, b1, w2, b2))
    ref = mlp_reference(x, w1, b1, w2, b2)
    assert out.shape == (batch, output_size)
    assert jnp.allclose(out, ref, atol=1e-2, rtol=1e-2), "mismatch (resident path)"

    # --- Batch tiling + partial last batch block (still resident weights). ---
    B2, in2, hid2, out2 = 1037, 128, 256, 128
    k1, k2, k3, k4, k5, krest = jax.random.split(krest, 6)
    x_b = jax.random.normal(k1, (B2, in2), dtype=jnp.float32)
    w1_b = jax.random.normal(k2, (hid2, in2), dtype=jnp.float32) * 0.05
    b1_b = jax.random.normal(k3, (hid2,), dtype=jnp.float32) * 0.05
    w2_b = jax.random.normal(k4, (out2, hid2), dtype=jnp.float32) * 0.05
    b2_b = jax.random.normal(k5, (out2,), dtype=jnp.float32) * 0.05

    out_b = jax.block_until_ready(mlp_forward(x_b, w1_b, b1_b, w2_b, b2_b))
    ref_b = mlp_reference(x_b, w1_b, b1_b, w2_b, b2_b)
    assert out_b.shape == (B2, out2)
    assert jnp.allclose(out_b, ref_b, atol=1e-2, rtol=1e-2), "mismatch (batch-tiled)"

    # --- Force the hidden-dim reduction (accumulator) path via a tiny VMEM
    #     budget; exercises hidden tiling (384 = 3 x 128), output padding
    #     (200 -> 256) and a partial last batch block (67 rows). ---
    B3, in3, hid3, out3 = 67, 256, 384, 200
    k1, k2, k3, k4, k5, _ = jax.random.split(krest, 6)
    x_t = jax.random.normal(k1, (B3, in3), dtype=jnp.float32)
    w1_t = jax.random.normal(k2, (hid3, in3), dtype=jnp.float32) * 0.05
    b1_t = jax.random.normal(k3, (hid3,), dtype=jnp.float32) * 0.05
    w2_t = jax.random.normal(k4, (out3, hid3), dtype=jnp.float32) * 0.05
    b2_t = jax.random.normal(k5, (out3,), dtype=jnp.float32) * 0.05

    out_t = jax.block_until_ready(
        mlp_forward(x_t, w1_t, b1_t, w2_t, b2_t, max_vmem_bytes=350 * 1024)
    )
    ref_t = mlp_reference(x_t, w1_t, b1_t, w2_t, b2_t)
    assert out_t.shape == (B3, out3)
    assert jnp.allclose(out_t, ref_t, atol=1e-2, rtol=1e-2), "mismatch (hidden-tiled)"

    print("KERNEL_OK")
</pallas_src>

<mosaic_0001>
module attributes {stable_mosaic.version = 11 : i64} {
  func.func @_mlp_kernel_resident(%arg0: i32, %arg1: memref<8x32xbf16, #tpu.memory_space<vmem>>, %arg2: memref<32x64xbf16, #tpu.memory_space<vmem>>, %arg3: memref<1x64xf32, #tpu.memory_space<vmem>>, %arg4: memref<64x128xbf16, #tpu.memory_space<vmem>>, %arg5: memref<1x128xf32, #tpu.memory_space<vmem>>, %arg6: memref<8x128xf32, #tpu.memory_space<vmem>>) attributes {dimension_semantics = [#tpu.dimension_semantics<parallel>], iteration_bounds = array<i64: 1>, scalar_prefetch = 0 : i64, scratch_operands = 0 : i64, tpu.core_type = #tpu.core_type<tc>, window_params = [{transform_indices = @transform_0, window_bounds = array<i64: 8, 32>}, {pipeline_mode = #tpu.pipeline_mode<synchronous>, transform_indices = @transform_1, window_bounds = array<i64: 32, 64>}, {pipeline_mode = #tpu.pipeline_mode<synchronous>, transform_indices = @transform_2, window_bounds = array<i64: 1, 64>}, {pipeline_mode = #tpu.pipeline_mode<synchronous>, transform_indices = @transform_3, window_bounds = array<i64: 64, 128>}, {pipeline_mode = #tpu.pipeline_mode<synchronous>, transform_indices = @transform_4, window_bounds = array<i64: 1, 128>}, {transform_indices = @transform_5, window_bounds = array<i64: 8, 128>}]} {
    %c0 = arith.constant 0 : index
    %c0_0 = arith.constant 0 : index
    %0 = vector.load %arg1[%c0, %c0_0] : memref<8x32xbf16, #tpu.memory_space<vmem>>, vector<8x32xbf16>
    %c0_1 = arith.constant 0 : index
    %c0_2 = arith.constant 0 : index
    %1 = vector.load %arg2[%c0_1, %c0_2] : memref<32x64xbf16, #tpu.memory_space<vmem>>, vector<32x64xbf16>
    %cst = arith.constant dense<0.000000e+00> : vector<8x64xf32>
    %2 = tpu.matmul %0, %1, %cst {dimension_numbers = #tpu.dot_dimension_numbers<[1], [0], [0], [1], [0, 0, 1, 1], [], []>} : vector<8x32xbf16>, vector<32x64xbf16>, vector<8x64xf32> -> vector<8x64xf32>
    %c0_3 = arith.constant 0 : index
    %c0_4 = arith.constant 0 : index
    %3 = vector.load %arg3[%c0_3, %c0_4] : memref<1x64xf32, #tpu.memory_space<vmem>>, vector<1x64xf32>
    %4 = vector.broadcast %3 : vector<1x64xf32> to vector<8x64xf32>
    %5 = arith.addf %2, %4 : vector<8x64xf32>
    %6 = arith.truncf %5 : vector<8x64xf32> to vector<8x64xbf16>
    %c0_5 = arith.constant 0 : index
    %c0_6 = arith.constant 0 : index
    %7 = vector.load %arg4[%c0_5, %c0_6] : memref<64x128xbf16, #tpu.memory_space<vmem>>, vector<64x128xbf16>
    %cst_7 = arith.constant dense<0.000000e+00> : vector<8x128xf32>
    %8 = tpu.matmul %6, %7, %cst_7 {dimension_numbers = #tpu.dot_dimension_numbers<[1], [0], [0], [1], [0, 0, 1, 1], [], []>} : vector<8x64xbf16>, vector<64x128xbf16>, vector<8x128xf32> -> vector<8x128xf32>
    %c0_8 = arith.constant 0 : index
    %c0_9 = arith.constant 0 : index
    %9 = vector.load %arg5[%c0_8, %c0_9] : memref<1x128xf32, #tpu.memory_space<vmem>>, vector<1x128xf32>
    %10 = vector.broadcast %9 : vector<1x128xf32> to vector<8x128xf32>
    %11 = arith.addf %8, %10 : vector<8x128xf32>
    %c0_10 = arith.constant 0 : index
    %c0_11 = arith.constant 0 : index
    %12 = vector.load %arg6[%c0_10, %c0_11] : memref<8x128xf32, #tpu.memory_space<vmem>>, vector<8x128xf32>
    tpu.vector_store %arg6[%c0_10, %c0_11], %11 {strides = array<i32>} : memref<8x128xf32, #tpu.memory_space<vmem>>, vector<8x128xf32>,
    return
  }
  func.func @transform_0(%arg0: i32) -> (i32, i32) {
    %c0_i32 = arith.constant 0 : i32
    %c0_i32_0 = arith.constant 0 : i32
    return %arg0, %c0_i32 : i32, i32
  }
  func.func @transform_1(%arg0: i32) -> (i32, i32) {
    %c0_i32 = arith.constant 0 : i32
    %c0_i32_0 = arith.constant 0 : i32
    %c0_i32_1 = arith.constant 0 : i32
    return %c0_i32, %c0_i32_0 : i32, i32
  }
  func.func @transform_2(%arg0: i32) -> (i32, i32) {
    %c0_i32 = arith.constant 0 : i32
    %c0_i32_0 = arith.constant 0 : i32
    %c0_i32_1 = arith.constant 0 : i32
    return %c0_i32, %c0_i32_0 : i32, i32
  }
  func.func @transform_3(%arg0: i32) -> (i32, i32) {
    %c0_i32 = arith.constant 0 : i32
    %c0_i32_0 = arith.constant 0 : i32
    %c0_i32_1 = arith.constant 0 : i32
    return %c0_i32, %c0_i32_0 : i32, i32
  }
  func.func @transform_4(%arg0: i32) -> (i32, i32) {
    %c0_i32 = arith.constant 0 : i32
    %c0_i32_0 = arith.constant 0 : i32
    %c0_i32_1 = arith.constant 0 : i32
    return %c0_i32, %c0_i32_0 : i32, i32
  }
  func.func @transform_5(%arg0: i32) -> (i32, i32) {
    %c0_i32 = arith.constant 0 : i32
    %c0_i32_0 = arith.constant 0 : i32
    return %arg0, %c0_i32 : i32, i32
  }
}

module attributes {stable_mosaic.version = 11 : i64} {
  func.func @_mlp_kernel_resident(%arg0: i32, %arg1: memref<8x32xbf16, #tpu.memory_space<vmem>>, %arg2: memref<32x64xbf16, #tpu.memory_space<vmem>>, %arg3: memref<1x64xf32, #tpu.memory_space<vmem>>, %arg4: memref<64x128xbf16, #tpu.memory_space<vmem>>, %arg5: memref<1x128xf32, #tpu.memory_space<vmem>>, %arg6: memref<8x128xf32, #tpu.memory_space<vmem>>) attributes {dimension_semantics = [#tpu.dimension_semantics<parallel>], iteration_bounds = array<i64: 1>, scalar_prefetch = 0 : i64, scratch_operands = 0 : i64, tpu.core_type = #tpu.core_type<tc>, window_params = [{transform_indices = @transform_0, window_bounds = array<i64: 8, 32>}, {pipeline_mode = #tpu.pipeline_mode<synchronous>, transform_indices = @transform_1, window_bounds = array<i64: 32, 64>}, {pipeline_mode = #tpu.pipeline_mode<synchronous>, transform_indices = @transform_2, window_bounds = array<i64: 1, 64>}, {pipeline_mode = #tpu.pipeline_mode<synchronous>, transform_indices = @transform_3, window_bounds = array<i64: 64, 128>}, {pipeline_mode = #tpu.pipeline_mode<synchronous>, transform_indices = @transform_4, window_bounds = array<i64: 1, 128>}, {transform_indices = @transform_5, window_bounds = array<i64: 8, 128>}]} {
    %c0 = arith.constant 0 : index
    %c0_0 = arith.constant 0 : index
    %0 = vector.load %arg1[%c0, %c0_0] : memref<8x32xbf16, #tpu.memory_space<vmem>>, vector<8x32xbf16>
    %c0_1 = arith.constant 0 : index
    %c0_2 = arith.constant 0 : index
    %1 = vector.load %arg2[%c0_1, %c0_2] : memref<32x64xbf16, #tpu.memory_space<vmem>>, vector<32x64xbf16>
    %cst = arith.constant dense<0.000000e+00> : vector<8x64xf32>
    %2 = tpu.matmul %0, %1, %cst {dimension_numbers = #tpu.dot_dimension_numbers<[1], [0], [0], [1], [0, 0, 1, 1], [], []>} : vector<8x32xbf16>, vector<32x64xbf16>, vector<8x64xf32> -> vector<8x64xf32>
    %c0_3 = arith.constant 0 : index
    %c0_4 = arith.constant 0 : index
    %3 = vector.load %arg3[%c0_3, %c0_4] : memref<1x64xf32, #tpu.memory_space<vmem>>, vector<1x64xf32>
    %4 = vector.broadcast %3 : vector<1x64xf32> to vector<8x64xf32>
    %5 = arith.addf %2, %4 : vector<8x64xf32>
    %6 = arith.truncf %5 : vector<8x64xf32> to vector<8x64xbf16>
    %c0_5 = arith.constant 0 : index
    %c0_6 = arith.constant 0 : index
    %7 = vector.load %arg4[%c0_5, %c0_6] : memref<64x128xbf16, #tpu.memory_space<vmem>>, vector<64x128xbf16>
    %cst_7 = arith.constant dense<0.000000e+00> : vector<8x128xf32>
    %8 = tpu.matmul %6, %7, %cst_7 {dimension_numbers = #tpu.dot_dimension_numbers<[1], [0], [0], [1], [0, 0, 1, 1], [], []>} : vector<8x64xbf16>, vector<64x128xbf16>, vector<8x128xf32> -> vector<8x128xf32>
    %c0_8 = arith.constant 0 : index
    %c0_9 = arith.constant 0 : index
    %9 = vector.load %arg5[%c0_8, %c0_9] : memref<1x128xf32, #tpu.memory_space<vmem>>, vector<1x128xf32>
    %10 = vector.broadcast %9 : vector<1x128xf32> to vector<8x128xf32>
    %11 = arith.addf %8, %10 : vector<8x128xf32>
    %c0_10 = arith.constant 0 : index
    %c0_11 = arith.constant 0 : index
    %12 = vector.load %arg6[%c0_10, %c0_11] : memref<8x128xf32, #tpu.memory_space<vmem>>, vector<8x128xf32>
    tpu.vector_store %arg6[%c0_10, %c0_11], %11 {strides = array<i32>} : memref<8x128xf32, #tpu.memory_space<vmem>>, vector<8x128xf32>,
    return
  }
  func.func @transform_0(%arg0: i32) -> (i32, i32) {
    %c0_i32 = arith.constant 0 : i32
    %c0_i32_0 = arith.constant 0 : i32
    return %arg0, %c0_i32 : i32, i32
  }
  func.func @transform_1(%arg0: i32) -> (i32, i32) {
    %c0_i32 = arith.constant 0 : i32
    %c0_i32_0 = arith.constant 0 : i32
    %c0_i32_1 = arith.constant 0 : i32
    return %c0_i32, %c0_i32_0 : i32, i32
  }
  func.func @transform_2(%arg0: i32) -> (i32, i32) {
    %c0_i32 = arith.constant 0 : i32
    %c0_i32_0 = arith.constant 0 : i32
    %c0_i32_1 = arith.constant 0 : i32
    return %c0_i32, %c0_i32_0 : i32, i32
  }
  func.func @transform_3(%arg0: i32) -> (i32, i32) {
    %c0_i32 = arith.constant 0 : i32
    %c0_i32_0 = arith.constant 0 : i32
    %c0_i32_1 = arith.constant 0 : i32
    return %c0_i32, %c0_i32_0 : i32, i32
  }
  func.func @transform_4(%arg0: i32) -> (i32, i32) {
    %c0_i32 = arith.constant 0 : i32
    %c0_i32_0 = arith.constant 0 : i32
    %c0_i32_1 = arith.constant 0 : i32
    return %c0_i32, %c0_i32_0 : i32, i32
  }
  func.func @transform_5(%arg0: i32) -> (i32, i32) {
    %c0_i32 = arith.constant 0 : i32
    %c0_i32_0 = arith.constant 0 : i32
    return %arg0, %c0_i32 : i32, i32
  }
}

</mosaic_0001>

<bundles_post_ra>
// kernel: tpu_custom_call.1
= control target key start
LH: loop header
LB: loop body
LE: loop exit
PB: predicated region body
PF: predicated region fallthrough
CT: control target
= control target key end

     0   :  { %10 = vsyncpa [#allocation3], 0  ;;  %s474_s0 = inlined_call_operand.hbm [shape: bf16[8,32], index: 0, kind: input, shape index: {}]   ;;  %s475_s1 = inlined_call_operand.hbm [shape: bf16[32,64], index: 1, kind: input, shape index: {}]   ;;  %s476_s2 = inlined_call_operand.vmem [shape: f32[1,64], index: 2, kind: input, shape index: {}]   ;;  %s477_s3 = inlined_call_operand.hbm [shape: bf16[64,128], index: 3, kind: input, shape index: {}]   ;;  %s478_s4 = inlined_call_operand.vmem [shape: f32[1,128], index: 4, kind: input, shape index: {}]   ;;  %s479_s5 = inlined_call_operand.hbm [shape: f32[8,128], index: 5, kind: output, shape index: {}]  }
   0x1   :  { %11 = vsyncpa [#allocation6], 0 }
   0x2   :  { %12 = vsyncpa [#allocation4], 0  ;;  %s376_s18 = smov [#allocation5]   ;;  %s282_s22 = scalar_lea.hbm %s475_s1, 256 }
   0x3   :  { %s28_s19 = sshll.u32 %s376_s18, 4  ;;  %p283_p0 = scmp.ne.s32.totalorder %s475_s1, %s282_s22  ;;  %s29_s19 = int_to_ptr.vmem [resolvable:$true] %s28_s19 }
   0x4   :  { %p286_p1 = scmp.lt.u32.totalorder %s282_s22, %s475_s1 }
   0x6   :  { %p288_p2 = pnand %p286_p1, %p283_p0 }
   0x8   :  { %291 = shalt.err (!%p288_p2)
}
   0x9   :  { %s292_s27 = scalar_lea.vmem %s29_s19, 256  ;;  %p297_p4 = scmp.lt.s32.totalorder %s29_s19, %s29_s19 }
   0xa   :  { %p293_p3 = scmp.ne.s32.totalorder %s29_s19, %s292_s27  ;;  %p298_p5 = scmp.lt.s32.totalorder %s292_s27, %s292_s27 }
   0xc   :  { %p299_p6 = por %p298_p5, %p297_p4 }
   0xe   :  { %p300_p7 = pnand %p299_p6, %p293_p3 }
  0x10   :  { %303 = shalt.err (!%p300_p7)
}
  0x11   :  { %s377_s28 = smov 64   ;;  %s378_s29 = smov 4  }
  0x12   :  { %34 = dma.hbm_to_vmem [thread:$0]  %s475_s1, 256, %s29_s19, [#allocation6], %s377_s28, %s377_s28, %s378_s29  }
  0x13   :  { %s379_s7 = smov [#allocation2]   ;;  %s380_s9 = smov [#allocation7]  }
  0x14   :  { %s19_s8 = sshll.u32 %s379_s7, 4  ;;  %s42_s10 = sshll.u32 %s380_s9, 4  ;;  %s20_s8 = int_to_ptr.vmem [resolvable:$true] %s19_s8  ;;  %s43_s10 = int_to_ptr.vmem [resolvable:$true] %s42_s10 }
  0x15   :  { %s304_s13 = scalar_lea.hbm %s474_s0, 64 }
  0x16   :  { %p305_p8 = scmp.ne.s32.totalorder %s474_s0, %s304_s13  ;;  %p308_p9 = scmp.lt.u32.totalorder %s304_s13, %s474_s0 }
  0x18   :  { %p310_p10 = pnand %p308_p9, %p305_p8 }
  0x1a   :  { %313 = shalt.err (!%p310_p10)
}
  0x1b   :  { %s314_s1 = scalar_lea.vmem %s20_s8, 64  ;;  %p319_p12 = scmp.lt.s32.totalorder %s20_s8, %s20_s8 }
  0x1c   :  { %p315_p11 = scmp.ne.s32.totalorder %s20_s8, %s314_s1  ;;  %p320_p13 = scmp.lt.s32.totalorder %s314_s1, %s314_s1 }
  0x1e   :  { %p321_p0 = por %p320_p13, %p319_p12 }
  0x20   :  { %p322_p1 = pnand %p321_p0, %p315_p11 }
  0x22   :  { %325 = shalt.err (!%p322_p1)
}
  0x23   :  { %22 = dma.hbm_to_vmem [thread:$0]  %s474_s0, 64, %s20_s8, [#allocation3]  }
  0x24   :  { %s326_s22 = scalar_lea.hbm %s477_s3, 512 }
  0x25   :  { %p327_p2 = scmp.ne.s32.totalorder %s477_s3, %s326_s22  ;;  %p330_p3 = scmp.lt.u32.totalorder %s326_s22, %s477_s3 }
  0x27   :  { %p332_p4 = pnand %p330_p3, %p327_p2 }
  0x29   :  { %335 = shalt.err (!%p332_p4)
}
  0x2a   :  { %s336_s27 = scalar_lea.vmem %s43_s10, 512  ;;  %p341_p6 = scmp.lt.s32.totalorder %s43_s10, %s43_s10 }
  0x2b   :  { %p337_p5 = scmp.ne.s32.totalorder %s43_s10, %s336_s27  ;;  %p342_p7 = scmp.lt.s32.totalorder %s336_s27, %s336_s27 }
  0x2d   :  { %p343_p8 = por %p342_p7, %p341_p6 }
  0x2f   :  { %p344_p9 = pnand %p343_p8, %p337_p5 }
  0x31   :  { %347 = shalt.err (!%p344_p9)
}
  0x32   :  { %48 = dma.hbm_to_vmem [thread:$0]  %s477_s3, 512, %s43_s10, [#allocation6], %s377_s28, %s377_s28, %s378_s29  }
  0x33   :  { %370 = dma.done.wait [#allocation3], 64  }
  0x34   :  { %371 = vsyncadd [#allocation3], 4294967232 }
  0x35   :  { %372 = dma.done.wait [#allocation6], 768  }
  0x36   :  { %373 = vsyncadd [#allocation6], 4294966528  ;;  %v381_v0 = vmov 0.0   ;;  %vm382_vm0 = vmmov 0   ;;  %v276_v1 = vld [vmem:[#allocation5] sm:$0xff]   ;;  %v277_v2 = vld [vmem:[#allocation5 + $0x8] sm:$0xff]  }
  0x37   :  { %248 = vmatprep.subr.bf16.mxu0 %v381_v0  ;;  %252 = vmatprep.mubr.msk.bf16.mxu0 %vm382_vm0, %v381_v0  ;;  %v278_v3 = vld [vmem:[#allocation7] sm:$0xff]   ;;  %v279_v4 = vld [vmem:[#allocation7 + $0x8] sm:$0xff]   ;;  %vm85_vm1 = vcmask 261120   ;;  %v280_v6 = vld [vmem:[#allocation7 + $0x10] sm:$0xff]   ;;  %vm169_vm2 = vcmask 523264   ;;  %s383_s7 = smov [#allocation8]  }
  0x38   :  { %256 = vmatprep.subr.bf16.mxu1 %v381_v0  ;;  %264 = vmatprep.mubr.msk.bf16.mxu1 %vm382_vm0, %v381_v0  ;;  %v61_v5 = vld [vmem:[#allocation2] sm:$0xf]  ;;  %v281_v7 = vld [vmem:[#allocation7 + $0x18] sm:$0xff]   ;;  %s220_s8 = sshll.u32 %s383_s7, 4  ;;  %s221_s8 = int_to_ptr.vmem [resolvable:$true] %s220_s8 }
  0x39   :  { %249 = vmatpush3.bf16.msra.mxu0 %v276_v1  ;;  %257 = vmatpush3.bf16.msra.mxu1 %v278_v3  ;;  %v230_v8 = vld [vmem:[%s476_s2] ss:$0 sm:$0xff]  ;;  %s348_s2 = scalar_lea.vmem %s221_s8, 128  ;;  %p353_p11 = scmp.lt.s32.totalorder %s221_s8, %s221_s8 }
  0x3a   :  { %250 = vmatprep.subr.bf16.mxu0 %v381_v0  ;;  %258 = vmatprep.subr.bf16.mxu1 %v381_v0  ;;  %v234_v15 = vld [vmem:[%s478_s4] ss:$0 sm:$0xff]  ;;  %p349_p10 = scmp.ne.s32.totalorder %s221_s8, %s348_s2  ;;  %p354_p12 = scmp.lt.s32.totalorder %s348_s2, %s348_s2 }
  0x3c   :  { %p355_p13 = por %p354_p12, %p353_p11 }
  0x3d   :  { %251 = vmatpush3.bf16.msra.mxu0 %v277_v2  ;;  %259 = vmatpush3.bf16.msra.mxu1 %v279_v4 }
  0x3e   :  { %260 = vmatprep.subr.bf16.mxu1 %v381_v0  ;;  %p356_p0 = pnand %p355_p13, %p349_p10 }
  0x40   :  { %253 = vmatmul.mubr.msk.bf16.vlgmr.msra.gmra.mrb[0].mxu0 %vm85_vm1, %v61_v5 }
  0x41   :  { %261 = vmatpush3.bf16.msra.mxu1 %v280_v6 }
  0x42   :  { %262 = vmatprep.subr.bf16.mxu1 %v381_v0 }
  0x45   :  { %263 = vmatpush3.bf16.msra.mxu1 %v281_v7 }
 0x113   :  { %v123_v9 = vpop.f32.mrb[0].mxu0 }
 0x114   :  { %v124_v10 = vadd.f32 %v230_v8, %v123_v9  ;;  %v254_v11 = vpop.f32.mrb[1].mxu0 }
 0x115   :  { %v126_v12 = vpop.f32.mrb[2].mxu0 }
 0x116   :  { %v129_v13 = vpack.c.bf16 %v124_v10, %v124_v10  ;;  %v255_v14 = vpop.f32.mrb[3].mxu0 }
 0x118   :  { %265 = vmatmul.mubr.msk.bf16.vlgmr.msra.gmra.mrb[0].mxu1 %vm169_vm2, %v129_v13 }
 0x1eb   :  { %v207_v16 = vpop.f32.mrb[0].mxu1 }
 0x1ec   :  { %v208_v17 = vadd.f32 %v234_v15, %v207_v16  ;;  %v266_v18 = vpop.f32.mrb[1].mxu1 }
 0x1ed   :  { %v210_v19 = vpop.f32.mrb[2].mxu1 }
 0x1ee   :  { %213 = vst [vmem:[#allocation8] sm:$0xff] %v208_v17  ;;  %v267_v20 = vpop.f32.mrb[3].mxu1 }
 0x1ef   :  { %359 = shalt.err (!%p356_p0)
}
 0x1f0   :  { %s360_s4 = scalar_lea.hbm %s479_s5, 128 }
 0x1f1   :  { %p361_p1 = scmp.ne.s32.totalorder %s479_s5, %s360_s4  ;;  %p364_p2 = scmp.lt.u32.totalorder %s360_s4, %s479_s5 }
 0x1f3   :  { %p366_p3 = pnand %p364_p2, %p361_p1 }
 0x1f5   :  { %369 = shalt.err (!%p366_p3)
}
 0x1f6   :  { %223 = dma.vmem_to_hbm [thread:$0]  %s221_s8, 128, %s479_s5, [#allocation4]  }
 0x1f7   :  { %374 = dma.done.wait [#allocation4], 128  }
 0x1f8   :  { %375 = vsyncadd [#allocation4], 4294967168 }
 0x1f9   :  { %227 = vsyncpa [#allocation3], 1 }
 0x1fa   :  { %228 = vsyncpa [#allocation6], 1 }
 0x1fb   :  { %229 = vsyncpa [#allocation4], 1 }

// kernel: tpu_custom_call.1
= control target key start
LH: loop header
LB: loop body
LE: loop exit
PB: predicated region body
PF: predicated region fallthrough
CT: control target
= control target key end

     0   :  { %10 = vsyncpa [#allocation3], 0  ;;  %s474_s0 = inlined_call_operand.hbm [shape: bf16[8,32], index: 0, kind: input, shape index: {}]   ;;  %s475_s1 = inlined_call_operand.hbm [shape: bf16[32,64], index: 1, kind: input, shape index: {}]   ;;  %s476_s2 = inlined_call_operand.vmem [shape: f32[1,64], index: 2, kind: input, shape index: {}]   ;;  %s477_s3 = inlined_call_operand.hbm [shape: bf16[64,128], index: 3, kind: input, shape index: {}]   ;;  %s478_s4 = inlined_call_operand.vmem [shape: f32[1,128], index: 4, kind: input, shape index: {}]   ;;  %s479_s5 = inlined_call_operand.hbm [shape: f32[8,128], index: 5, kind: output, shape index: {}]  }
   0x1   :  { %11 = vsyncpa [#allocation6], 0 }
   0x2   :  { %12 = vsyncpa [#allocation4], 0  ;;  %s376_s18 = smov [#allocation5]   ;;  %s282_s22 = scalar_lea.hbm %s475_s1, 256 }
   0x3   :  { %s28_s19 = sshll.u32 %s376_s18, 4  ;;  %p283_p0 = scmp.ne.s32.totalorder %s475_s1, %s282_s22  ;;  %s29_s19 = int_to_ptr.vmem [resolvable:$true] %s28_s19 }
   0x4   :  { %p286_p1 = scmp.lt.u32.totalorder %s282_s22, %s475_s1 }
   0x6   :  { %p288_p2 = pnand %p286_p1, %p283_p0 }
   0x8   :  { %291 = shalt.err (!%p288_p2)
}
   0x9   :  { %s292_s27 = scalar_lea.vmem %s29_s19, 256  ;;  %p297_p4 = scmp.lt.s32.totalorder %s29_s19, %s29_s19 }
   0xa   :  { %p293_p3 = scmp.ne.s32.totalorder %s29_s19, %s292_s27  ;;  %p298_p5 = scmp.lt.s32.totalorder %s292_s27, %s292_s27 }
   0xc   :  { %p299_p6 = por %p298_p5, %p297_p4 }
   0xe   :  { %p300_p7 = pnand %p299_p6, %p293_p3 }
  0x10   :  { %303 = shalt.err (!%p300_p7)
}
  0x11   :  { %s377_s28 = smov 64   ;;  %s378_s29 = smov 4  }
  0x12   :  { %34 = dma.hbm_to_vmem [thread:$0]  %s475_s1, 256, %s29_s19, [#allocation6], %s377_s28, %s377_s28, %s378_s29  }
  0x13   :  { %s379_s7 = smov [#allocation2]   ;;  %s380_s9 = smov [#allocation7]  }
  0x14   :  { %s19_s8 = sshll.u32 %s379_s7, 4  ;;  %s42_s10 = sshll.u32 %s380_s9, 4  ;;  %s20_s8 = int_to_ptr.vmem [resolvable:$true] %s19_s8  ;;  %s43_s10 = int_to_ptr.vmem [resolvable:$true] %s42_s10 }
  0x15   :  { %s304_s13 = scalar_lea.hbm %s474_s0, 64 }
  0x16   :  { %p305_p8 = scmp.ne.s32.totalorder %s474_s0, %s304_s13  ;;  %p308_p9 = scmp.lt.u32.totalorder %s304_s13, %s474_s0 }
  0x18   :  { %p310_p10 = pnand %p308_p9, %p305_p8 }
  0x1a   :  { %313 = shalt.err (!%p310_p10)
}
  0x1b   :  { %s314_s1 = scalar_lea.vmem %s20_s8, 64  ;;  %p319_p12 = scmp.lt.s32.totalorder %s20_s8, %s20_s8 }
  0x1c   :  { %p315_p11 = scmp.ne.s32.totalorder %s20_s8, %s314_s1  ;;  %p320_p13 = scmp.lt.s32.totalorder %s314_s1, %s314_s1 }
  0x1e   :  { %p321_p0 = por %p320_p13, %p319_p12 }
  0x20   :  { %p322_p1 = pnand %p321_p0, %p315_p11 }
  0x22   :  { %325 = shalt.err (!%p322_p1)
}
  0x23   :  { %22 = dma.hbm_to_vmem [thread:$0]  %s474_s0, 64, %s20_s8, [#allocation3]  }
  0x24   :  { %s326_s22 = scalar_lea.hbm %s477_s3, 512 }
  0x25   :  { %p327_p2 = scmp.ne.s32.totalorder %s477_s3, %s326_s22  ;;  %p330_p3 = scmp.lt.u32.totalorder %s326_s22, %s477_s3 }
  0x27   :  { %p332_p4 = pnand %p330_p3, %p327_p2 }
  0x29   :  { %335 = shalt.err (!%p332_p4)
}
  0x2a   :  { %s336_s27 = scalar_lea.vmem %s43_s10, 512  ;;  %p341_p6 = scmp.lt.s32.totalorder %s43_s10, %s43_s10 }
  0x2b   :  { %p337_p5 = scmp.ne.s32.totalorder %s43_s10, %s336_s27  ;;  %p342_p7 = scmp.lt.s32.totalorder %s336_s27, %s336_s27 }
  0x2d   :  { %p343_p8 = por %p342_p7, %p341_p6 }
  0x2f   :  { %p344_p9 = pnand %p343_p8, %p337_p5 }
  0x31   :  { %347 = shalt.err (!%p344_p9)
}
  0x32   :  { %48 = dma.hbm_to_vmem [thread:$0]  %s477_s3, 512, %s43_s10, [#allocation6], %s377_s28, %s377_s28, %s378_s29  }
  0x33   :  { %370 = dma.done.wait [#allocation3], 64  }
  0x34   :  { %371 = vsyncadd [#allocation3], 4294967232 }
  0x35   :  { %372 = dma.done.wait [#allocation6], 768  }
  0x36   :  { %373 = vsyncadd [#allocation6], 4294966528  ;;  %v381_v0 = vmov 0.0   ;;  %vm382_vm0 = vmmov 0   ;;  %v276_v1 = vld [vmem:[#allocation5] sm:$0xff]   ;;  %v277_v2 = vld [vmem:[#allocation5 + $0x8] sm:$0xff]  }
  0x37   :  { %248 = vmatprep.subr.bf16.mxu0 %v381_v0  ;;  %252 = vmatprep.mubr.msk.bf16.mxu0 %vm382_vm0, %v381_v0  ;;  %v278_v3 = vld [vmem:[#allocation7] sm:$0xff]   ;;  %v279_v4 = vld [vmem:[#allocation7 + $0x8] sm:$0xff]   ;;  %vm85_vm1 = vcmask 261120   ;;  %v280_v6 = vld [vmem:[#allocation7 + $0x10] sm:$0xff]   ;;  %vm169_vm2 = vcmask 523264   ;;  %s383_s7 = smov [#allocation8]  }
  0x38   :  { %256 = vmatprep.subr.bf16.mxu1 %v381_v0  ;;  %264 = vmatprep.mubr.msk.bf16.mxu1 %vm382_vm0, %v381_v0  ;;  %v61_v5 = vld [vmem:[#allocation2] sm:$0xf]  ;;  %v281_v7 = vld [vmem:[#allocation7 + $0x18] sm:$0xff]   ;;  %s220_s8 = sshll.u32 %s383_s7, 4  ;;  %s221_s8 = int_to_ptr.vmem [resolvable:$true] %s220_s8 }
  0x39   :  { %249 = vmatpush3.bf16.msra.mxu0 %v276_v1  ;;  %257 = vmatpush3.bf16.msra.mxu1 %v278_v3  ;;  %v230_v8 = vld [vmem:[%s476_s2] ss:$0 sm:$0xff]  ;;  %s348_s2 = scalar_lea.vmem %s221_s8, 128  ;;  %p353_p11 = scmp.lt.s32.totalorder %s221_s8, %s221_s8 }
  0x3a   :  { %250 = vmatprep.subr.bf16.mxu0 %v381_v0  ;;  %258 = vmatprep.subr.bf16.mxu1 %v381_v0  ;;  %v234_v15 = vld [vmem:[%s478_s4] ss:$0 sm:$0xff]  ;;  %p349_p10 = scmp.ne.s32.totalorder %s221_s8, %s348_s2  ;;  %p354_p12 = scmp.lt.s32.totalorder %s348_s2, %s348_s2 }
  0x3c   :  { %p355_p13 = por %p354_p12, %p353_p11 }
  0x3d   :  { %251 = vmatpush3.bf16.msra.mxu0 %v277_v2  ;;  %259 = vmatpush3.bf16.msra.mxu1 %v279_v4 }
  0x3e   :  { %260 = vmatprep.subr.bf16.mxu1 %v381_v0  ;;  %p356_p0 = pnand %p355_p13, %p349_p10 }
  0x40   :  { %253 = vmatmul.mubr.msk.bf16.vlgmr.msra.gmra.mrb[0].mxu0 %vm85_vm1, %v61_v5 }
  0x41   :  { %261 = vmatpush3.bf16.msra.mxu1 %v280_v6 }
  0x42   :  { %262 = vmatprep.subr.bf16.mxu1 %v381_v0 }
  0x45   :  { %263 = vmatpush3.bf16.msra.mxu1 %v281_v7 }
 0x113   :  { %v123_v9 = vpop.f32.mrb[0].mxu0 }
 0x114   :  { %v124_v10 = vadd.f32 %v230_v8, %v123_v9  ;;  %v254_v11 = vpop.f32.mrb[1].mxu0 }
 0x115   :  { %v126_v12 = vpop.f32.mrb[2].mxu0 }
 0x116   :  { %v129_v13 = vpack.c.bf16 %v124_v10, %v124_v10  ;;  %v255_v14 = vpop.f32.mrb[3].mxu0 }
 0x118   :  { %265 = vmatmul.mubr.msk.bf16.vlgmr.msra.gmra.mrb[0].mxu1 %vm169_vm2, %v129_v13 }
 0x1eb   :  { %v207_v16 = vpop.f32.mrb[0].mxu1 }
 0x1ec   :  { %v208_v17 = vadd.f32 %v234_v15, %v207_v16  ;;  %v266_v18 = vpop.f32.mrb[1].mxu1 }
 0x1ed   :  { %v210_v19 = vpop.f32.mrb[2].mxu1 }
 0x1ee   :  { %213 = vst [vmem:[#allocation8] sm:$0xff] %v208_v17  ;;  %v267_v20 = vpop.f32.mrb[3].mxu1 }
 0x1ef   :  { %359 = shalt.err (!%p356_p0)
}
 0x1f0   :  { %s360_s4 = scalar_lea.hbm %s479_s5, 128 }
 0x1f1   :  { %p361_p1 = scmp.ne.s32.totalorder %s479_s5, %s360_s4  ;;  %p364_p2 = scmp.lt.u32.totalorder %s360_s4, %s479_s5 }
 0x1f3   :  { %p366_p3 = pnand %p364_p2, %p361_p1 }
 0x1f5   :  { %369 = shalt.err (!%p366_p3)
}
 0x1f6   :  { %223 = dma.vmem_to_hbm [thread:$0]  %s221_s8, 128, %s479_s5, [#allocation4]  }
 0x1f7   :  { %374 = dma.done.wait [#allocation4], 128  }
 0x1f8   :  { %375 = vsyncadd [#allocation4], 4294967168 }
 0x1f9   :  { %227 = vsyncpa [#allocation3], 1 }
 0x1fa   :  { %228 = vsyncpa [#allocation6], 1 }
 0x1fb   :  { %229 = vsyncpa [#allocation4], 1 }

</bundles_post_ra>
